<compile_context>
chip_gen: v7x
topology: tpu7x:2x2x1
jax: 0.10.0
libtpu: 0.0.40
codegen_flags: <defaults>
</compile_context>

<pallas_src>
import math

import jax
import jax.numpy as jnp
from jax.experimental import pallas as pl
from jax.experimental.pallas import tpu as pltpu


# ----------------------------------------------------------------------------
# Kernel bodies (minimal: upcast, one vmul [+ one vadd], cast, one store)
# ----------------------------------------------------------------------------

def _scale_kernel(w_ref, x_ref, o_ref):
    # w_ref: (1, lt) fp32 expanded weight; x_ref / o_ref: (rt, lt) activation dtype.
    # Multiply in fp32 (PyTorch fp32-parameter promotion); store in the I/O dtype.
    o_ref[...] = (x_ref[...].astype(jnp.float32) * w_ref[...]).astype(o_ref.dtype)


def _scale_residual_kernel(w_ref, x_ref, r_ref, o_ref):
    # Fused VanLayer epilogue (eval): out = residual + weight * x
    # (saves one full HBM read+write of the activation vs a standalone scale).
    o_ref[...] = (r_ref[...].astype(jnp.float32)
                  + x_ref[...].astype(jnp.float32) * w_ref[...]).astype(o_ref.dtype)


# ----------------------------------------------------------------------------
# Tiling / VMEM planning
# ----------------------------------------------------------------------------

_WEIGHT_ITEMSIZE = 4  # expanded weight is kept in fp32


def _vmem_cap_bytes() -> int:
    """Per-generation scoped-VMEM budget: ~75% of physical VMEM, capped at 96 MiB.
    v7x (64 MiB physical) -> 48 MiB; v5e/v6e (128 MiB physical) -> 96 MiB."""
    try:
        cap = int(pltpu.get_tpu_info().vmem_capacity_bytes)
    except Exception:                       # not queryable -> conservative (v7x-sized)
        cap = 64 << 20
    return min((cap * 3) // 4, 96 << 20)


def _vmem_need_bytes(rt, lt, itemsize, n_streams):
    """Double-buffered working set + 25% headroom: 2*(streams*block + weight blk)*1.25."""
    block = rt * lt * itemsize
    return int(2 * (n_streams * block + lt * _WEIGHT_ITEMSIZE) * 1.25)


def _plan_tiles(n, Lp, itemsize, n_streams, vmem_cap, target_block_bytes, min_steps):
    """Pick (rt, lt) such that:
      * lt is a multiple of 128 dividing Lp; rt divides n and is a multiple of 8
        (or rt == n when n is small / not a multiple of 8),
      * each (rt, lt) block is ~target_block_bytes (sized by bytes, not lane count),
      * the double-buffered working set fits the per-generation VMEM cap,
      * there are >= min_steps grid steps whenever the data can be split
        (keeps both v7x TensorCores fed),
      * ties prefer long lane tiles (long contiguous DMA segments, lane-dense
        stores); the row tile grows past 8 only when the lane axis alone cannot
        reach the byte target (small H*W stages with large batch)."""
    if n % 8 == 0 and n > 8:
        row_opts = [r for r in range(8, n + 1, 8) if n % r == 0]
    else:
        row_opts = [n]
    m = Lp // 128
    lane_opts = [128 * k for k in range(1, m + 1) if m % k == 0]

    best = None
    for rt in row_opts:
        for lt in lane_opts:
            if _vmem_need_bytes(rt, lt, itemsize, n_streams) > vmem_cap:
                continue
            block = rt * lt * itemsize
            steps = (n // rt) * (Lp // lt)
            key = (steps < min_steps,                            # feed both v7x TCs
                   abs(math.log2(block / target_block_bytes)),   # ~target-sized blocks
                   Lp // lt,                                     # prefer long lane tiles
                   n // rt)                                      # then larger row tiles
            if best is None or key < best[0]:
                best = (key, rt, lt)
    if best is None:                        # pathological: smallest block misses the cap
        return row_opts[0], lane_opts[0]
    return best[1], best[2]


# ----------------------------------------------------------------------------
# Shared launcher
# ----------------------------------------------------------------------------

def _run_lane_tiled(kernel, w2, tensors, n, Lp, dtype, *,
                    target_block_bytes, input_output_aliases=None):
    itemsize = jnp.dtype(dtype).itemsize
    n_streams = len(tensors) + 1                       # tiled inputs + the output
    vmem_cap = _vmem_cap_bytes()
    rt, lt = _plan_tiles(n, Lp, itemsize, n_streams, vmem_cap,
                         target_block_bytes, min_steps=2)

    # Lane axis OUTER, rows inner: the (0, j) weight block index only changes with
    # the outer index, so Pallas skips the weight re-DMA across consecutive steps.
    grid = (Lp // lt, n // rt)

    vmem_limit = int(min(vmem_cap,
                         max(_vmem_need_bytes(rt, lt, itemsize, n_streams), 8 << 20)))

    tile_spec = pl.BlockSpec((rt, lt), lambda j, i: (i, j))
    w_spec = pl.BlockSpec((1, lt), lambda j, i: (0, j))

    flops = (n_streams - 1) * n * Lp                   # one mul (+ one add when fused)
    bytes_accessed = n_streams * n * Lp * itemsize + Lp * _WEIGHT_ITEMSIZE

    return pl.pallas_call(
        kernel,
        out_shape=jax.ShapeDtypeStruct((n, Lp), dtype),
        grid_spec=pltpu.PrefetchScalarGridSpec(
            num_scalar_prefetch=0,
            grid=grid,
            in_specs=[w_spec] + [tile_spec] * len(tensors),
            out_specs=tile_spec,
        ),
        compiler_params=pltpu.CompilerParams(
            dimension_semantics=("parallel", "parallel"),
            vmem_limit_bytes=vmem_limit,
        ),
        cost_estimate=pl.CostEstimate(flops=flops, transcendentals=0,
                                      bytes_accessed=bytes_accessed),
        input_output_aliases=input_output_aliases or {},
    )(w2, *tensors)


# ----------------------------------------------------------------------------
# Public wrappers (NCHW in / NCHW out) — jit-compatible
# ----------------------------------------------------------------------------

def expand_van_scale_weight(weight: jax.Array, spatial_size: int) -> jax.Array:
    """Pre-expand the (C,) scale along the flattened C*H*W lane axis (fp32).

    Build this once per layer (hoisted / cached by the caller) to avoid
    re-emitting the repeat/broadcast HLO on every forward call."""
    return jnp.repeat(weight.astype(jnp.float32), spatial_size)


def _prep(x, weight, expanded_weight):
    n, c, h, w = x.shape
    hw = h * w
    L = c * hw
    Lp = ((L + 127) // 128) * 128          # pad lane axis to a multiple of 128
    x2 = x.reshape(n, L)
    w1 = expanded_weight if expanded_weight is not None else \
        expand_van_scale_weight(weight, hw)
    w2 = w1.astype(jnp.float32).reshape(1, L)
    if Lp != L:                            # only for odd shapes; never for real VAN stages
        x2 = jnp.pad(x2, ((0, 0), (0, Lp - L)))
        w2 = jnp.pad(w2, ((0, 0), (0, Lp - L)))
    return x2, w2, n, c, h, w, L, Lp


def van_layer_scaling(x: jax.Array, weight: jax.Array, *,
                      expanded_weight: jax.Array | None = None,
                      target_block_bytes: int = 2 << 20) -> jax.Array:
    """out = weight[None, :, None, None] * x   (x: (N, C, H, W), weight: (C,))."""
    x2, w2, n, c, h, w, L, Lp = _prep(x, weight, expanded_weight)
    out = _run_lane_tiled(_scale_kernel, w2, [x2], n, Lp, x.dtype,
                          target_block_bytes=target_block_bytes)
    if Lp != L:
        out = out[:, :L]
    return out.reshape(n, c, h, w)


def van_layer_scaling_residual(x: jax.Array, residual: jax.Array, weight: jax.Array, *,
                               expanded_weight: jax.Array | None = None,
                               donate_residual: bool = False,
                               target_block_bytes: int = 2 << 20) -> jax.Array:
    """Fused VanLayer epilogue (eval mode): residual + weight[None,:,None,None] * x.

    Pass donate_residual=True when the caller can donate `residual`'s buffer: the
    output is then written in place via input_output_aliases (cuts allocator
    pressure in the VanStage layer loop).  Without donation XLA inserts a copy,
    so it is off by default."""
    x2, w2, n, c, h, w, L, Lp = _prep(x, weight, expanded_weight)
    r2 = residual.reshape(n, L).astype(x.dtype)
    if Lp != L:
        r2 = jnp.pad(r2, ((0, 0), (0, Lp - L)))
    aliases = {2: 0} if donate_residual else None      # args are (w2, x2, r2)
    out = _run_lane_tiled(_scale_residual_kernel, w2, [x2, r2], n, Lp, x.dtype,
                          target_block_bytes=target_block_bytes,
                          input_output_aliases=aliases)
    if Lp != L:
        out = out[:, :L]
    return out.reshape(n, c, h, w)


if __name__ == "__main__":
    key = jax.random.PRNGKey(0)
    kx, kr, k7 = jax.random.split(key, 3)

    # Small shapes consistent with the module: NCHW activations, per-channel weight.
    N, C, H, W = 2, 4, 16, 16
    initial_value = 0.01

    x = jax.random.normal(kx, (N, C, H, W), dtype=jnp.float32)
    residual = jax.random.normal(kr, (N, C, H, W), dtype=jnp.float32)
    # Deterministic parameter init matching VanLayerScaling.__init__
    weight = initial_value * jnp.ones((C,), dtype=jnp.float32)

    # 1) Standalone VanLayerScaling (f32).
    out = jax.block_until_ready(van_layer_scaling(x, weight))
    ref = weight[None, :, None, None] * x
    assert out.shape == x.shape
    assert jnp.allclose(out, ref, atol=1e-6, rtol=1e-6)

    # 2) Fused scale + residual add (VanLayer epilogue; drop_path == identity in eval),
    #    with and without in-place residual aliasing.
    ref2 = residual + weight[None, :, None, None] * x
    out2 = jax.block_until_ready(van_layer_scaling_residual(x, residual, weight))
    assert jnp.allclose(out2, ref2, atol=1e-6, rtol=1e-6)
    out2d = jax.block_until_ready(
        van_layer_scaling_residual(x, residual, weight, donate_residual=True))
    assert jnp.allclose(out2d, ref2, atol=1e-6, rtol=1e-6)

    # 3) bf16 activations with a hoisted fp32 expanded weight (memory-bound op: half
    #    the bytes; the multiply still happens in fp32 like PyTorch's fp32 parameter).
    xb = x.astype(jnp.bfloat16)
    w_exp = expand_van_scale_weight(weight, H * W)       # hoisted / cached by the caller
    outb = jax.block_until_ready(van_layer_scaling(xb, weight, expanded_weight=w_exp))
    refb = (weight[None, :, None, None] * xb.astype(jnp.float32)).astype(jnp.bfloat16)
    assert outb.dtype == jnp.bfloat16
    assert jnp.allclose(outb.astype(jnp.float32), refb.astype(jnp.float32),
                        atol=1e-2, rtol=1e-2)

    # 4) Odd spatial size like late VAN stages (C*H*W not a multiple of 128 -> the
    #    lane axis is zero-padded to 128 in the wrapper and sliced back afterwards).
    x7 = jax.random.normal(k7, (2, 8, 7, 7), dtype=jnp.float32)
    w7 = initial_value * jnp.ones((8,), dtype=jnp.float32)
    out7 = jax.block_until_ready(van_layer_scaling(x7, w7))
    ref7 = w7[None, :, None, None] * x7
    assert jnp.allclose(out7, ref7, atol=1e-6, rtol=1e-6)

    print("KERNEL_OK")
</pallas_src>

<mosaic_0001>
module attributes {stable_mosaic.version = 11 : i64} {
  func.func @_scale_kernel(%arg0: i32, %arg1: i32, %arg2: memref<1x512xf32, #tpu.memory_space<vmem>>, %arg3: memref<2x512xf32, #tpu.memory_space<vmem>>, %arg4: memref<2x512xf32, #tpu.memory_space<vmem>>) attributes {dimension_semantics = [#tpu.dimension_semantics<parallel>, #tpu.dimension_semantics<parallel>], iteration_bounds = array<i64: 2, 1>, scalar_prefetch = 0 : i64, scratch_operands = 0 : i64, tpu.core_type = #tpu.core_type<tc>, window_params = [{transform_indices = @transform_0, window_bounds = array<i64: 1, 512>}, {transform_indices = @transform_1, window_bounds = array<i64: 2, 512>}, {transform_indices = @transform_2, window_bounds = array<i64: 2, 512>}]} {
    %c0 = arith.constant 0 : index
    %c0_0 = arith.constant 0 : index
    %0 = vector.load %arg3[%c0, %c0_0] : memref<2x512xf32, #tpu.memory_space<vmem>>, vector<2x512xf32>
    %c0_1 = arith.constant 0 : index
    %c0_2 = arith.constant 0 : index
    %1 = vector.load %arg2[%c0_1, %c0_2] : memref<1x512xf32, #tpu.memory_space<vmem>>, vector<1x512xf32>
    %2 = vector.broadcast %1 : vector<1x512xf32> to vector<2x512xf32>
    %3 = arith.mulf %0, %2 : vector<2x512xf32>
    %c0_3 = arith.constant 0 : index
    %c0_4 = arith.constant 0 : index
    %4 = vector.load %arg4[%c0_3, %c0_4] : memref<2x512xf32, #tpu.memory_space<vmem>>, vector<2x512xf32>
    tpu.vector_store %arg4[%c0_3, %c0_4], %3 {strides = array<i32>} : memref<2x512xf32, #tpu.memory_space<vmem>>, vector<2x512xf32>,
    return
  }
  func.func @transform_0(%arg0: i32, %arg1: i32) -> (i32, i32) {
    %c0_i32 = arith.constant 0 : i32
    %c0_i32_0 = arith.constant 0 : i32
    return %c0_i32, %arg0 : i32, i32
  }
  func.func @transform_1(%arg0: i32, %arg1: i32) -> (i32, i32) {
    %c0_i32 = arith.constant 0 : i32
    return %arg1, %arg0 : i32, i32
  }
  func.func @transform_2(%arg0: i32, %arg1: i32) -> (i32, i32) {
    %c0_i32 = arith.constant 0 : i32
    return %arg1, %arg0 : i32, i32
  }
}

</mosaic_0001>

<bundles_post_ra>
// kernel: tpu_custom_call.1
= control target key start
LH: loop header
LB: loop body
LE: loop exit
PB: predicated region body
PF: predicated region fallthrough
CT: control target
= control target key end

     0   :  { %7 = vsyncpa [#allocation3], 0  ;;  %s854_s0 = inlined_call_operand.hbm [shape: f32[1,1024], index: 0, kind: input, shape index: {}]   ;;  %s855_s1 = inlined_call_operand.hbm [shape: f32[2,1024], index: 1, kind: input, shape index: {}]   ;;  %s856_s2 = inlined_call_operand.hbm [shape: f32[2,1024], index: 2, kind: output, shape index: {}]  }
   0x1   :  { %9 = vsyncpa [#allocation3 + $0x1], 0 }
   0x2   :  { %10 = vsyncpa [#allocation6], 0 }
   0x3   :  { %12 = vsyncpa [#allocation6 + $0x1], 0 }
   0x4   :  { %13 = vsyncpa [#allocation4], 0 }
   0x5   :  { %15 = vsyncpa [#allocation4 + $0x1], 0  ;;  %s639_s9 = smov 0   ;;  %s641_s10 = smov 0  }
   0x6   :  { %s643_s11 = smov 0   ;;  %s645_s12 = smov 0  }
   0x7   :  { %s647_s13 = smov 0   ;;  %s649_s14 = smov 0  }
   0x8 LB: > { %s382_s15 = sadd.s32 4294967295, %s618_s14   ;;  %s383_s16 = sadd.s32 4294967294, %s618_s14   ;;  %s618_s14 = sphi %s649_s14, %s21_s14   ;;  %s614_s13 = sphi %s647_s13, %s876_s13   ;;  %s610_s12 = sphi %s645_s12, %s875_s12   ;;  %s606_s11 = sphi %s643_s11, %s874_s11   ;;  %s602_s10 = sphi %s641_s10, %s873_s10   ;;  %s598_s9 = sphi %s639_s9, %s872_s9  }
   0x9   : > { %s33_s17 = sadd.s32 1, %s614_s13  ;;  %s40_s18 = sadd.s32 1, %s606_s11 }
   0xa   : > { %p35_p0 = scmp.ge.s32.totalorder %s33_s17, 2  ;;  %p47_p1 = scmp.ne.s32.totalorder %s606_s11, %s602_s10 }
   0xb   : > { %p48_p2 = scmp.eq.s32.totalorder %s618_s14, 0  ;;  %p53_p3 = scmp.ne.s32.totalorder %s602_s10, %s598_s9 }
   0xc   : > { %s878_s17 = smov (%p35_p0, %s33_s17), 0  ;;  %p54_p5 = scmp.eq.s32.totalorder %s382_s15, 0 }
   0xd   : > { %p680_p4 = por %p48_p2, %p47_p1  ;;  %s37_s20 = ssub.s32 %s614_s13, %s878_s17 }
   0xe   : > { %p107_p6 = scmp.eq.s32.totalorder %s382_s15, 1  ;;  %p38_p7 = scmp.eq.s32.totalorder %s37_s20, 0 }
   0xf   : > { %p686_p8 = por %p54_p5, %p53_p3  ;;  %p113_p10 = scmp.eq.s32.totalorder %s383_s16, 1 }
  0x10   : > { %p690_p9 = por %p107_p6, %p47_p1  ;;  %p421_p13 = scmp.lt.s32.totalorder %s618_s14, 2 }
  0x11   : > { %s860_s21 = scalar_select %p686_p8, 1, 0 }
  0x12   : > { %s861_s22 = scalar_select %p690_p9, 1, 0 }
  0x13   : > { %s695_s23 = scalar_select %p38_p7, %s606_s11, %s40_s18  }
  0x14   : > { %p697_p11 = por %p113_p10, %p53_p3  ;;  %s704_s25 = sand.u32 1, %s606_s11  }
  0x15   : > { %s386_s26 = sshll.u32 %s704_s25, 2  ;;  %s401_s27 = sshll.u32 %s614_s13, 6 }
  0x16   : > { %s862_s24 = scalar_select %p697_p11, 1, 0 }
  0x17   : > { %s711_s30 = scalar_lea.hbm %s854_s0, %s401_s27  ;;  %s137_s3 = scalar_lea.vmem [#allocation2], %s386_s26 }
  0x18   : > { %s145_s4 = sshll.u32 %s137_s3, 4  ;;  %p717_p0 = pnand %p421_p13, %p680_p4  ;;  %s713_s4 = int_to_ptr.vmem [resolvable:$true] %s145_s4 }
  0x19   : > { %s134_s6 = scalar_lea.sflag [#allocation3], %s704_s25  ;;  %s472_s7 = scalar_lea.hbm %s711_s30, 64 }
  0x1a   : > { %p473_p3 = scmp.ne.s32.totalorder %s711_s30, %s472_s7  ;;  %p474_p5 = pneg %p717_p0 }
  0x1b   : > { %s477_s16 = scalar_lea.hbm %s854_s0, 128  ;;  %p478_p4 = scmp.lt.u32.totalorder %s711_s30, %s854_s0 }
  0x1c   : > { %p475_p6 = pnand %p474_p5, %p473_p3  ;;  %p479_p10 = scmp.lt.u32.totalorder %s477_s16, %s472_s7 }
  0x1d   : > { %p481_p12 = scmp.lt.u32.totalorder %s472_s7, %s711_s30 }
  0x1e   : > { %p476_p7 = pneg %p475_p6  ;;  %p480_p13 = por %p479_p10, %p478_p4 }
  0x20   : > { %p482_p1 = por %p481_p12, %p480_p13 }
  0x22   : > { %p483_p2 = pnand %p482_p1, %p476_p7 }
  0x24   : > { %486 = shalt.err (!%p483_p2)
}
  0x25   : > { %s487_s20 = scalar_lea.vmem %s713_s4, 64  ;;  %s620_s26 = smov [#allocation2]  }
  0x26   : > { %p488_p3 = scmp.ne.s32.totalorder %s713_s4, %s487_s20  ;;  %s492_s27 = sshll.u32 %s620_s26, 4  ;;  %s493_s27 = int_to_ptr.vmem [resolvable:$false] %s492_s27 }
  0x27   : > { %s494_s28 = scalar_lea.vmem %s493_s27, 128  ;;  %p495_p9 = scmp.lt.s32.totalorder %s713_s4, %s493_s27 }
  0x28   : > { %p490_p6 = pnand %p488_p3, %p474_p5  ;;  %p496_p4 = scmp.lt.s32.totalorder %s494_s28, %s487_s20 }
  0x2a   : > { %p491_p11 = pneg %p490_p6  ;;  %p497_p10 = por %p496_p4, %p495_p9 }
  0x2c   : > { %p498_p12 = pnand %p497_p10, %p491_p11 }
  0x2e   : > { %501 = shalt.err (!%p498_p12)
}
  0x2f   : > { %413 = dma.hbm_to_vmem [thread:$0]  (!%p717_p0), %s711_s30, 64, %s713_s4, %s134_s6  }
  0x30   : > { %p864_p1 = scmp.lt.s32.totalorder %s618_s14, 3  ;;  %p865_p2 = scmp.ge.s32.totalorder %s618_s14, 1 }
  0x31   : > { %s389_s3 = sshll.u32 %s704_s25, 3  ;;  %s402_s7 = sshll.u32 %s614_s13, 7 }
  0x32   : > { %p753_p7 = pnand %p865_p2, %p864_p1  ;;  %s762_s16 = scalar_lea.hbm %s855_s1, %s402_s7 }
  0x33   : > { %s156_s18 = scalar_lea.vmem [#allocation5], %s389_s3  ;;  %s153_s30 = scalar_lea.sflag [#allocation6], %s704_s25 }
  0x34   : > { %s866_s29 = scalar_select %p753_p7, 1, 0 }
  0x35   : > { %s166_s19 = sshll.u32 %s156_s18, 4  ;;  %s502_s4 = scalar_lea.hbm %s762_s16, 128  ;;  %s167_s19 = int_to_ptr.vmem [resolvable:$true] %s166_s19 }
  0x36   : > { %p503_p9 = scmp.ne.s32.totalorder %s762_s16, %s502_s4  ;;  %s507_s26 = scalar_lea.hbm %s855_s1, 256 }
  0x37   : > { %p508_p3 = scmp.lt.u32.totalorder %s762_s16, %s855_s1  ;;  %p509_p6 = scmp.lt.u32.totalorder %s507_s26, %s502_s4 }
  0x38   : > { %p505_p11 = pnand %p503_p9, %p474_p5  ;;  %p511_p10 = scmp.lt.u32.totalorder %s502_s4, %s762_s16 }
  0x39   : > { %p510_p4 = por %p509_p6, %p508_p3 }
  0x3a   : > { %p506_p13 = pneg %p505_p11 }
  0x3b   : > { %p512_p12 = por %p511_p10, %p510_p4 }
  0x3d   : > { %p513_p1 = pnand %p512_p12, %p506_p13 }
  0x3f   : > { %516 = shalt.err (!%p513_p1)
}
  0x40   : > { %s517_s25 = scalar_lea.vmem %s167_s19, 128  ;;  %s621_s3 = smov [#allocation5]  }
  0x41   : > { %p518_p2 = scmp.ne.s32.totalorder %s167_s19, %s517_s25  ;;  %s522_s7 = sshll.u32 %s621_s3, 4  ;;  %s523_s7 = int_to_ptr.vmem [resolvable:$false] %s522_s7 }
  0x42   : > { %s524_s8 = scalar_lea.vmem %s523_s7, 256  ;;  %p525_p8 = scmp.lt.s32.totalorder %s167_s19, %s523_s7 }
  0x43   : > { %p520_p9 = pnand %p518_p2, %p474_p5  ;;  %p526_p7 = scmp.lt.s32.totalorder %s524_s8, %s517_s25 }
  0x45   : > { %p521_p11 = pneg %p520_p9  ;;  %p527_p3 = por %p526_p7, %p525_p8 }
  0x47   : > { %p528_p6 = pnand %p527_p3, %p521_p11 }
  0x49   : > { %531 = shalt.err (!%p528_p6)
}
  0x4a   : > { %416 = dma.hbm_to_vmem [thread:$0]  (!%p717_p0), %s762_s16, 128, %s167_s19, %s153_s30  }
  0x4b   : > { %p867_p13 = scmp.ne.s32.totalorder %s866_s29, 0 }
  0x4c   : > { %s787_s15 = sand.u32 (!%p867_p13), 1, %s602_s10   ;;  %p868_p5 = scmp.ne.s32.totalorder (!%p867_p13), %s860_s21, 0 }
  0x4d   : > { %175 = sbr.rel (%p867_p13) target bundleno = 118 (0x76), region = 28  ;;  %s393_s18 = sshll.u32 (!%p867_p13), %s787_s15, 2 }
  0x4e   : > { %s178_s4 = scalar_lea.sflag (!%p867_p13), [#allocation3], %s787_s15  ;;  %s181_s6 = scalar_lea.vmem (!%p867_p13), [#allocation2], %s393_s18 }
  0x54   : > { %585 = dma.done.wait (%p868_p5), %s178_s4, 64  }
  0x55   : > { %587 = vsyncadd (%p868_p5), %s178_s4, 4294967232  ;;  %s394_s5 = sshll.u32 %s787_s15, 3  ;;  %s187_s29 = scalar_lea.sflag [#allocation6], %s787_s15 }
  0x56   : > { %s190_s16 = scalar_lea.vmem [#allocation5], %s394_s5 }
  0x57   : > { %589 = dma.done.wait (%p868_p5), %s187_s29, 128  }
  0x58   : > { %591 = vsyncadd (%p868_p5), %s187_s29, 4294967168  ;;  %v222_v0 = vlaneseq  ;;  %v622_v1 = vmov 1983009808   ;;  %v220_v9 = vld [vmem:[%s181_s6] sm:$0xf]  ;;  %v219_v19 = vld [vmem:[%s190_s16] sm:$0xff] }
  0x59   : > { %v241_v2 = vunpack.c.l.s4 %v622_v1  ;;  %s215_s21 = scalar_lea.vmem [#allocation7], %s394_s5  ;;  %s403_s30 = sshll.u32 %s610_s12, 7 }
  0x5a   : > { %v223_v3 = vshrl.u32 %v222_v0, 7  ;;  %s275_s19 = sshll.u32 %s215_s21, 4  ;;  %s807_s27 = scalar_lea.hbm %s856_s2, %s403_s30  ;;  %s802_s19 = int_to_ptr.vmem [resolvable:$true] %s275_s19 }
  0x5b   : > { %v242_v4 = vunpack.c.0.s8 %v241_v2  ;;  %s259_s28 = scalar_lea.sflag [#allocation4], %s787_s15  ;;  %s532_s25 = scalar_lea.vmem %s802_s19, 128 }
  0x5c   : > { %v224_v5 = vsub.s32 0, %v223_v3  ;;  %v228_v6 = vsub.s32 1, %v223_v3  ;;  %v232_v7 = vsub.s32 2, %v223_v3  ;;  %v236_v8 = vsub.s32 3, %v223_v3  ;;  %p533_p8 = scmp.ne.s32.totalorder %s802_s19, %s532_s25  ;;  %p869_p0 = scmp.ne.s32.totalorder %s861_s22, 0 }
  0x5d   : > { %v245_v10 = vsub.s32 %v242_v4, %v223_v3  ;;  %s623_s12 = smov [#allocation7]  }
  0x5e   : > { %v225_v11 = vrot.slane %v220_v9, %v224_v5  ;;  %v229_v12 = vrot.slane %v220_v9, %v228_v6  ;;  %v233_v13 = vrot.slane %v220_v9, %v232_v7  ;;  %v237_v14 = vrot.slane %v220_v9, %v236_v8  ;;  %p534_p7 = pnand %p533_p8, %p869_p0  ;;  %s536_s3 = sshll.u32 %s623_s12, 4  ;;  %s537_s3 = int_to_ptr.vmem [resolvable:$false] %s536_s3 }
  0x5f   : > { %s538_s7 = scalar_lea.vmem %s537_s3, 256  ;;  %p539_p10 = scmp.lt.s32.totalorder %s802_s19, %s537_s3 }
  0x60   : > { %v238_v15 = vcombine.low %v225_v11, %v229_v12  ;;  %v239_v16 = vcombine.low %v233_v13, %v237_v14  ;;  %p535_p4 = pneg %p534_p7  ;;  %p540_p12 = scmp.lt.s32.totalorder %s538_s7, %s532_s25 }
  0x62   : > { %v246_v17 = vrot.slane %v238_v15, %v245_v10  ;;  %v253_v18 = vrot.slane %v239_v16, %v245_v10  ;;  %p541_p1 = por %p540_p12, %p539_p10 }
  0x64   : > { %v254_v20 = vcombine.low %v246_v17, %v253_v18  ;;  %p542_p2 = pnand %p541_p1, %p535_p4 }
  0x66   : > { %v256_v21 = vmul.f32 %v254_v20, %v219_v19 }
  0x68   : > { %257 = vst [vmem:[%s215_s21] sm:$0xff] %v256_v21 }
  0x69   : > { %545 = shalt.err (!%p542_p2)
}
  0x6a   : > { %s546_s8 = scalar_lea.hbm %s807_s27, 128  ;;  %s550_s4 = scalar_lea.hbm %s856_s2, 256 }
  0x6b   : > { %p547_p9 = scmp.ne.s32.totalorder %s807_s27, %s546_s8  ;;  %p551_p6 = scmp.lt.u32.totalorder %s807_s27, %s856_s2 }
  0x6c   : > { %p552_p13 = scmp.lt.u32.totalorder %s550_s4, %s546_s8  ;;  %p554_p8 = scmp.lt.u32.totalorder %s546_s8, %s807_s27 }
  0x6d   : > { %p548_p11 = pnand %p547_p9, %p869_p0 }
  0x6e   : > { %p553_p5 = por %p552_p13, %p551_p6 }
  0x6f   : > { %p549_p3 = pneg %p548_p11 }
  0x70   : > { %p555_p7 = por %p554_p8, %p553_p5 }
  0x72   : > { %p556_p4 = pnand %p555_p7, %p549_p3 }
  0x74   : > { %559 = shalt.err (!%p556_p4)
}
  0x75   : > { %408 = dma.vmem_to_hbm [thread:$0]  (%p869_p0), %s802_s19, 128, %s807_s27, %s259_s28  }
  0x76 PF: > { %s287_s29 = sand.u32 1, %s598_s9   ;;  %p870_p10 = scmp.ne.s32.totalorder %s862_s24, 0 }
  0x77   : > { %p871_p12 = scmp.ge.s32.totalorder %s618_s14, 2  ;;  %s288_s16 = scalar_lea.sflag [#allocation4], %s287_s29 }
  0x79   : > { %p418_p1 = pnand %p871_p12, %p870_p10 }
  0x7b   : > { %593 = dma.done.wait (!%p418_p1), %s288_s16, 128  }
  0x7c   : > { %595 = vsyncadd (!%p418_p1), %s288_s16, 4294967168  ;;  %s21_s14 = sadd.s32 1, %s618_s14   ;;  %s872_s9 = smov %s602_s10 }
  0x7d   : > { %p18_p2 = scmp.ge.s32.totalorder %s21_s14, 4   ;;  %s873_s10 = smov %s606_s11 }
  0x7e   : > { %s874_s11 = smov %s695_s23  ;;  %s875_s12 = smov %s614_s13 }
  0x7f   : > { %s876_s13 = smov %s878_s17  ;;  %20 = sbr.rel (!%p18_p2) target bundleno = 8 (0x8), region = 86 }
  0x86   :  { %293 = vsyncpa [#allocation3], 1 }
  0x87   :  { %295 = vsyncpa [#allocation3 + $0x1], 1 }
  0x88   :  { %296 = vsyncpa [#allocation6], 1 }
  0x89   :  { %298 = vsyncpa [#allocation6 + $0x1], 1 }
  0x8a   :  { %299 = vsyncpa [#allocation4], 1 }
  0x8b   :  { %301 = vsyncpa [#allocation4 + $0x1], 1 }

</bundles_post_ra>
